<compile_context>
chip_gen: v7x
topology: tpu7x:2x2x1
jax: 0.10.0
libtpu: 0.0.40
codegen_flags: <defaults>
</compile_context>

<pallas_src>
import math

import jax
import jax.numpy as jnp
from jax.experimental import pallas as pl
from jax.experimental.pallas import tpu as pltpu


# ----------------------------------------------------------------------------
# Tile-size helper: full dim if small, else the largest divisor <= target that
# is a multiple of one of `granules`; else the full dimension.
# ----------------------------------------------------------------------------
def _pick_tile(dim, target, granules):
    if dim <= target:
        return dim
    for g in granules:
        t = (target // g) * g
        while t >= g:
            if dim % t == 0:
                return t
            t -= g
    # TODO(synk): awkward dims with no aligned divisor fall back to the full
    # dimension; an explicit padding/masking path would be needed for huge N.
    return dim


# ----------------------------------------------------------------------------
# Tiled linear:  y = x @ W + b    (bf16 operands, f32 accumulation)
# grid = (M_tiles, Dout_tiles, Din_tiles); Din is the reduction ("arbitrary").
# ----------------------------------------------------------------------------
def _matmul_bias_kernel(x_ref, w_ref, b_ref, o_ref, acc_ref):
    @pl.when(pl.program_id(2) == 0)
    def _():
        acc_ref[...] = jnp.zeros_like(acc_ref)

    acc_ref[...] += jnp.dot(x_ref[...], w_ref[...],
                            preferred_element_type=jnp.float32)

    @pl.when(pl.program_id(2) == pl.num_programs(2) - 1)
    def _():
        o_ref[...] = (acc_ref[...] + b_ref[...]).astype(o_ref.dtype)


def pallas_linear(x, w, b, *, out_dtype=jnp.float32, tm=256, tn=512, tk=2048):
    """x: (M, Din), w: (Din, Dout), b: (Dout,) -> (M, Dout)."""
    M, Din = x.shape
    Dout = w.shape[1]
    tm = _pick_tile(M, tm, (16, 8))      # 16: keep bf16 rows natively packed
    tn = _pick_tile(Dout, tn, (128,))
    tk = _pick_tile(Din, tk, (128,))     # large tk: usually removes the K axis
    grid = (M // tm, Dout // tn, Din // tk)
    return pl.pallas_call(
        _matmul_bias_kernel,
        out_shape=jax.ShapeDtypeStruct((M, Dout), out_dtype),
        grid=grid,
        in_specs=[
            pl.BlockSpec((tm, tk), lambda i, j, k: (i, k)),
            pl.BlockSpec((tk, tn), lambda i, j, k: (k, j)),
            pl.BlockSpec((1, tn), lambda i, j, k: (0, j)),
        ],
        out_specs=pl.BlockSpec((tm, tn), lambda i, j, k: (i, j)),
        scratch_shapes=[pltpu.VMEM((tm, tn), jnp.float32)],
        compiler_params=pltpu.CompilerParams(
            dimension_semantics=("parallel", "parallel", "arbitrary")),
    )(x.astype(jnp.bfloat16), w.astype(jnp.bfloat16),
      b.astype(jnp.float32).reshape(1, Dout))


# ----------------------------------------------------------------------------
# Attention core: per (batch, head, q-tile) -> scores, softmax, attn @ v.
# Kernel refs (leading size-1 dims squeezed by the BlockSpecs):
#   q: (tq, dh)  k: (dh, N)  v: (N, dh)  ->  o: (tq, dh), a: (tq, N)
# K/V blocks are invariant along the (innermost, "arbitrary") q-tile axis, so
# they stay resident in VMEM across q tiles of one (b, h).
# ----------------------------------------------------------------------------
def _attn_kernel(q_ref, k_ref, v_ref, o_ref, a_ref):
    q = q_ref[...]                                   # (tq, dh) bf16, pre-scaled
    k = k_ref[...]                                   # (dh, N)  bf16, lane-dense
    v = v_ref[...]                                   # (N, dh)  bf16
    s = jnp.dot(q, k, preferred_element_type=jnp.float32)          # (tq, N)
    e = jnp.exp(s - jnp.max(s, axis=-1, keepdims=True))            # (tq, N)
    inv = 1.0 / jnp.sum(e, axis=-1, keepdims=True)                 # (tq, 1)
    # PV on unnormalized probabilities; normalize the small (tq, dh) result.
    o = jnp.dot(e.astype(v.dtype), v, preferred_element_type=jnp.float32) * inv
    a_ref[...] = (e * inv).astype(a_ref.dtype)
    o_ref[...] = o.astype(o_ref.dtype)


def _attn_tq(N):
    # ~2 MiB f32 (tq, N) attn block (double-buffered => ~4 MiB) so the kernel
    # fits v7x's 32 MiB scoped-VMEM default even at large N; cap at 256.
    target = int(max(16, min(256, (2 * 1024 * 1024) // (4 * N))))
    return _pick_tile(N, target, (16, 8))


_ATTN_PARAMS = pltpu.CompilerParams(
    # q-tile axis "arbitrary": megacore/dual-TC splits over b/h, so each core
    # keeps its K/V block resident instead of re-DMA-ing per core.
    dimension_semantics=("parallel", "parallel", "arbitrary"))


def attention_core_merged(q_m, kt, v_m, n_head):
    """q_m, v_m: (B, N, D) bf16 (heads lane-aligned, dh % 128 == 0);
    kt: (B, H, dh, N) bf16 -> (out (B, N, D) bf16, attn (B, H, N, N) f32)."""
    B, N, D = q_m.shape
    H = n_head
    dh = D // H
    tq = _attn_tq(N)
    grid = (B, H, N // tq)
    return pl.pallas_call(
        _attn_kernel,
        out_shape=(
            jax.ShapeDtypeStruct((B, N, D), jnp.bfloat16),
            jax.ShapeDtypeStruct((B, H, N, N), jnp.float32),
        ),
        grid=grid,
        in_specs=[
            pl.BlockSpec((None, tq, dh), lambda b, h, i: (b, i, h)),
            pl.BlockSpec((None, None, dh, N), lambda b, h, i: (b, h, 0, 0)),
            pl.BlockSpec((None, N, dh), lambda b, h, i: (b, 0, h)),
        ],
        out_specs=(
            pl.BlockSpec((None, tq, dh), lambda b, h, i: (b, i, h)),
            pl.BlockSpec((None, None, tq, N), lambda b, h, i: (b, h, i, 0)),
        ),
        compiler_params=_ATTN_PARAMS,
    )(q_m, kt, v_m)


def attention_core_split(qh, kt, vh):
    """qh, vh: (B, H, N, dh) bf16; kt: (B, H, dh, N) bf16
    -> (out_h (B, H, N, dh) bf16, attn (B, H, N, N) f32)."""
    B, H, N, dh = qh.shape
    tq = _attn_tq(N)
    grid = (B, H, N // tq)
    return pl.pallas_call(
        _attn_kernel,
        out_shape=(
            jax.ShapeDtypeStruct((B, H, N, dh), jnp.bfloat16),
            jax.ShapeDtypeStruct((B, H, N, N), jnp.float32),
        ),
        grid=grid,
        in_specs=[
            pl.BlockSpec((None, None, tq, dh), lambda b, h, i: (b, h, i, 0)),
            pl.BlockSpec((None, None, dh, N), lambda b, h, i: (b, h, 0, 0)),
            pl.BlockSpec((None, None, N, dh), lambda b, h, i: (b, h, 0, 0)),
        ],
        out_specs=(
            pl.BlockSpec((None, None, tq, dh), lambda b, h, i: (b, h, i, 0)),
            pl.BlockSpec((None, None, tq, N), lambda b, h, i: (b, h, i, 0)),
        ),
        compiler_params=_ATTN_PARAMS,
    )(qh, kt, vh)


# ----------------------------------------------------------------------------
# Full module forward.
# ----------------------------------------------------------------------------
def attention_forward(params, q, k, v, n_head):
    B, N, D = q.shape
    dh = D // n_head
    scale = 1.0 / math.sqrt(dh)
    M = B * N

    # Fold 1/sqrt(dh) into the Q projection (f32, before the bf16 cast).
    q_p = pallas_linear(q.reshape(M, D), params["wq"] * scale,
                        params["bq"] * scale, out_dtype=jnp.bfloat16)
    k_p = pallas_linear(k.reshape(M, D), params["wk"], params["bk"],
                        out_dtype=jnp.bfloat16)
    v_p = pallas_linear(v.reshape(M, D), params["wv"], params["bv"],
                        out_dtype=jnp.bfloat16)

    # Single XLA transpose for K: 'b n (h d) -> b h d n' (lane-dense RHS for a
    # plain jnp.dot inside the kernel; same cost as the old split_heads).
    kt = k_p.reshape(B, N, n_head, dh).transpose(0, 2, 3, 1)

    if dh % 128 == 0:
        # Lane-aligned heads: read Q/V heads and write the merged output
        # directly via lane-offset BlockSpecs (no split/merge transposes).
        out_m, attn = attention_core_merged(q_p.reshape(B, N, D), kt,
                                            v_p.reshape(B, N, D), n_head)
    else:
        # dh < 128: a dh-wide lane-offset block would violate the (8,128)
        # block constraint, so keep the head-split layout for Q/V/out.
        qh = q_p.reshape(B, N, n_head, dh).transpose(0, 2, 1, 3)
        vh = v_p.reshape(B, N, n_head, dh).transpose(0, 2, 1, 3)
        out_h, attn = attention_core_split(qh, kt, vh)
        out_m = out_h.transpose(0, 2, 1, 3).reshape(B, N, D)

    # out_proj as a full-depth tiled linear on the merged layout (tk up to D)
    # instead of a per-head dh-deep contraction (underfills the MXU).
    out = pallas_linear(out_m.reshape(M, D), params["wo"], params["bo"],
                        out_dtype=jnp.float32)
    return out.reshape(B, N, D), attn


# ----------------------------------------------------------------------------
# Deterministic parameter init (nn.Linear(d_model, d_model) shapes).
# Weights stored transposed, i.e. (in, out), so y = x @ W + b.
# ----------------------------------------------------------------------------
def init_params(key, d_model):
    keys = jax.random.split(key, 8)
    bound = 1.0 / math.sqrt(d_model)

    def w(k):
        return jax.random.uniform(k, (d_model, d_model), jnp.float32, -bound, bound)

    def b(k):
        return jax.random.uniform(k, (d_model,), jnp.float32, -bound, bound)

    return {
        "wq": w(keys[0]), "bq": b(keys[1]),
        "wk": w(keys[2]), "bk": b(keys[3]),
        "wv": w(keys[4]), "bv": b(keys[5]),
        "wo": w(keys[6]), "bo": b(keys[7]),
    }


# ----------------------------------------------------------------------------
# Pure-JAX f32 reference for validation.
# ----------------------------------------------------------------------------
def reference_forward(params, q, k, v, n_head):
    B, N, D = q.shape
    dh = D // n_head
    qp = q @ params["wq"] + params["bq"]
    kp = k @ params["wk"] + params["bk"]
    vp = v @ params["wv"] + params["bv"]

    def sh(x):
        return x.reshape(B, N, n_head, dh).transpose(0, 2, 1, 3)

    qh, kh, vh = sh(qp), sh(kp), sh(vp)
    s = jnp.einsum("bhnd,bhmd->bhnm", qh, kh) / math.sqrt(dh)
    p = jax.nn.softmax(s, axis=-1)
    o = jnp.einsum("bhnm,bhmd->bhnd", p, vh)
    o = o.transpose(0, 2, 1, 3).reshape(B, N, D)
    o = o @ params["wo"] + params["bo"]
    return o, p


if __name__ == "__main__":
    fwd = jax.jit(attention_forward, static_argnums=4)

    def run_case(B, N, d_model, n_head):
        root = jax.random.PRNGKey(0)
        kp, kq, kk, kv = jax.random.split(root, 4)
        params = init_params(kp, d_model)
        q = jax.random.normal(kq, (B, N, d_model), jnp.float32)
        k = jax.random.normal(kk, (B, N, d_model), jnp.float32)
        v = jax.random.normal(kv, (B, N, d_model), jnp.float32)

        out, attn = fwd(params, q, k, v, n_head)
        out = jax.block_until_ready(out)
        attn = jax.block_until_ready(attn)

        out_ref, attn_ref = reference_forward(params, q, k, v, n_head)
        assert out.shape == (B, N, d_model) and attn.shape == (B, n_head, N, N)
        # bf16 matmul operands => looser tolerances than pure f32.
        assert jnp.allclose(out, out_ref, atol=5e-2, rtol=5e-2)
        assert jnp.allclose(attn, attn_ref, atol=2e-2, rtol=2e-2)

    # dh = 8  < 128  -> head-split fallback path
    run_case(B=2, N=8, d_model=32, n_head=4)
    # dh = 128       -> transpose-free lane-offset path
    run_case(B=1, N=16, d_model=256, n_head=2)

    print("KERNEL_OK")
</pallas_src>

<mosaic_0001>
module attributes {stable_mosaic.version = 11 : i64} {
  func.func @_matmul_bias_kernel(%arg0: i32, %arg1: i32, %arg2: i32, %arg3: memref<16x32xbf16, #tpu.memory_space<vmem>>, %arg4: memref<32x32xbf16, #tpu.memory_space<vmem>>, %arg5: memref<1x32xf32, #tpu.memory_space<vmem>>, %arg6: memref<16x32xbf16, #tpu.memory_space<vmem>>, %arg7: memref<16x32xf32, #tpu.memory_space<vmem>>) attributes {dimension_semantics = [#tpu.dimension_semantics<parallel>, #tpu.dimension_semantics<parallel>, #tpu.dimension_semantics<arbitrary>], iteration_bounds = array<i64: 1, 1, 1>, scalar_prefetch = 0 : i64, scratch_operands = 1 : i64, tpu.core_type = #tpu.core_type<tc>, window_params = [{transform_indices = @transform_0, window_bounds = array<i64: 16, 32>}, {transform_indices = @transform_1, window_bounds = array<i64: 32, 32>}, {transform_indices = @transform_2, window_bounds = array<i64: 1, 32>}, {transform_indices = @transform_3, window_bounds = array<i64: 16, 32>}]} {
    %c0_i32 = arith.constant 0 : i32
    %0 = arith.cmpi eq, %arg2, %c0_i32 : i32
    %1 = arith.extui %0 : i1 to i32
    %c0_i32_0 = arith.constant 0 : i32
    %2 = arith.cmpi ne, %1, %c0_i32_0 : i32
    scf.if %2 {
      %cst_10 = arith.constant 0.000000e+00 : f32
      %12 = vector.broadcast %cst_10 : f32 to vector<16x32xf32>
      %c0_11 = arith.constant 0 : index
      %c0_12 = arith.constant 0 : index
      %13 = vector.load %arg7[%c0_11, %c0_12] : memref<16x32xf32, #tpu.memory_space<vmem>>, vector<16x32xf32>
      tpu.vector_store %arg7[%c0_11, %c0_12], %12 {strides = array<i32>} : memref<16x32xf32, #tpu.memory_space<vmem>>, vector<16x32xf32>,
    } else {
    }
    %c0 = arith.constant 0 : index
    %c0_1 = arith.constant 0 : index
    %3 = vector.load %arg7[%c0, %c0_1] : memref<16x32xf32, #tpu.memory_space<vmem>>, vector<16x32xf32>
    %c0_2 = arith.constant 0 : index
    %c0_3 = arith.constant 0 : index
    %4 = vector.load %arg3[%c0_2, %c0_3] : memref<16x32xbf16, #tpu.memory_space<vmem>>, vector<16x32xbf16>
    %c0_4 = arith.constant 0 : index
    %c0_5 = arith.constant 0 : index
    %5 = vector.load %arg4[%c0_4, %c0_5] : memref<32x32xbf16, #tpu.memory_space<vmem>>, vector<32x32xbf16>
    %cst = arith.constant dense<0.000000e+00> : vector<16x32xf32>
    %6 = tpu.matmul %4, %5, %cst {dimension_numbers = #tpu.dot_dimension_numbers<[1], [0], [0], [1], [0, 0, 1, 1], [], []>} : vector<16x32xbf16>, vector<32x32xbf16>, vector<16x32xf32> -> vector<16x32xf32>
    %7 = arith.addf %3, %6 : vector<16x32xf32>
    %c0_6 = arith.constant 0 : index
    %c0_7 = arith.constant 0 : index
    %8 = vector.load %arg7[%c0_6, %c0_7] : memref<16x32xf32, #tpu.memory_space<vmem>>, vector<16x32xf32>
    tpu.vector_store %arg7[%c0_6, %c0_7], %7 {strides = array<i32>} : memref<16x32xf32, #tpu.memory_space<vmem>>, vector<16x32xf32>,
    %c0_i32_8 = arith.constant 0 : i32
    %9 = arith.cmpi eq, %arg2, %c0_i32_8 : i32
    %10 = arith.extui %9 : i1 to i32
    %c0_i32_9 = arith.constant 0 : i32
    %11 = arith.cmpi ne, %10, %c0_i32_9 : i32
    scf.if %11 {
      %c0_10 = arith.constant 0 : index
      %c0_11 = arith.constant 0 : index
      %12 = vector.load %arg7[%c0_10, %c0_11] : memref<16x32xf32, #tpu.memory_space<vmem>>, vector<16x32xf32>
      %c0_12 = arith.constant 0 : index
      %c0_13 = arith.constant 0 : index
      %13 = vector.load %arg5[%c0_12, %c0_13] : memref<1x32xf32, #tpu.memory_space<vmem>>, vector<1x32xf32>
      %14 = vector.broadcast %13 : vector<1x32xf32> to vector<16x32xf32>
      %15 = arith.addf %12, %14 : vector<16x32xf32>
      %16 = arith.truncf %15 : vector<16x32xf32> to vector<16x32xbf16>
      %c0_14 = arith.constant 0 : index
      %c0_15 = arith.constant 0 : index
      %17 = vector.load %arg6[%c0_14, %c0_15] : memref<16x32xbf16, #tpu.memory_space<vmem>>, vector<16x32xbf16>
      tpu.vector_store %arg6[%c0_14, %c0_15], %16 {strides = array<i32>} : memref<16x32xbf16, #tpu.memory_space<vmem>>, vector<16x32xbf16>,
    } else {
    }
    return
  }
  func.func @transform_0(%arg0: i32, %arg1: i32, %arg2: i32) -> (i32, i32) {
    %c0_i32 = arith.constant 0 : i32
    return %arg0, %arg2 : i32, i32
  }
  func.func @transform_1(%arg0: i32, %arg1: i32, %arg2: i32) -> (i32, i32) {
    %c0_i32 = arith.constant 0 : i32
    return %arg2, %arg1 : i32, i32
  }
  func.func @transform_2(%arg0: i32, %arg1: i32, %arg2: i32) -> (i32, i32) {
    %c0_i32 = arith.constant 0 : i32
    %c0_i32_0 = arith.constant 0 : i32
    return %c0_i32, %arg1 : i32, i32
  }
  func.func @transform_3(%arg0: i32, %arg1: i32, %arg2: i32) -> (i32, i32) {
    %c0_i32 = arith.constant 0 : i32
    return %arg0, %arg1 : i32, i32
  }
}

module attributes {stable_mosaic.version = 11 : i64} {
  func.func @_attn_kernel(%arg0: i32, %arg1: i32, %arg2: i32, %arg3: memref<1x1x8x8xbf16, #tpu.memory_space<vmem>>, %arg4: memref<1x1x8x8xbf16, #tpu.memory_space<vmem>>, %arg5: memref<1x1x8x8xbf16, #tpu.memory_space<vmem>>, %arg6: memref<1x1x8x8xbf16, #tpu.memory_space<vmem>>, %arg7: memref<1x1x8x8xf32, #tpu.memory_space<vmem>>) attributes {dimension_semantics = [#tpu.dimension_semantics<parallel>, #tpu.dimension_semantics<parallel>, #tpu.dimension_semantics<arbitrary>], iteration_bounds = array<i64: 2, 4, 1>, scalar_prefetch = 0 : i64, scratch_operands = 0 : i64, tpu.core_type = #tpu.core_type<tc>, window_params = [{transform_indices = @transform_0, window_bounds = array<i64: 1, 1, 8, 8>}, {transform_indices = @transform_1, window_bounds = array<i64: 1, 1, 8, 8>}, {transform_indices = @transform_2, window_bounds = array<i64: 1, 1, 8, 8>}, {transform_indices = @transform_3, window_bounds = array<i64: 1, 1, 8, 8>}, {transform_indices = @transform_4, window_bounds = array<i64: 1, 1, 8, 8>}]} {
    %c0 = arith.constant 0 : index
    %c0_0 = arith.constant 0 : index
    %c0_1 = arith.constant 0 : index
    %c0_2 = arith.constant 0 : index
    %0 = vector.load %arg3[%c0, %c0_0, %c0_1, %c0_2] : memref<1x1x8x8xbf16, #tpu.memory_space<vmem>>, vector<1x1x8x8xbf16>
    %1 = vector.shape_cast %0 : vector<1x1x8x8xbf16> to vector<8x8xbf16>
    %c0_3 = arith.constant 0 : index
    %c0_4 = arith.constant 0 : index
    %c0_5 = arith.constant 0 : index
    %c0_6 = arith.constant 0 : index
    %2 = vector.load %arg4[%c0_3, %c0_4, %c0_5, %c0_6] : memref<1x1x8x8xbf16, #tpu.memory_space<vmem>>, vector<1x1x8x8xbf16>
    %3 = vector.shape_cast %2 : vector<1x1x8x8xbf16> to vector<8x8xbf16>
    %c0_7 = arith.constant 0 : index
    %c0_8 = arith.constant 0 : index
    %c0_9 = arith.constant 0 : index
    %c0_10 = arith.constant 0 : index
    %4 = vector.load %arg5[%c0_7, %c0_8, %c0_9, %c0_10] : memref<1x1x8x8xbf16, #tpu.memory_space<vmem>>, vector<1x1x8x8xbf16>
    %5 = vector.shape_cast %4 : vector<1x1x8x8xbf16> to vector<8x8xbf16>
    %cst = arith.constant dense<0.000000e+00> : vector<8x8xf32>
    %6 = tpu.matmul %1, %3, %cst {dimension_numbers = #tpu.dot_dimension_numbers<[1], [0], [0], [1], [0, 0, 1, 1], [], []>} : vector<8x8xbf16>, vector<8x8xbf16>, vector<8x8xf32> -> vector<8x8xf32>
    %cst_11 = arith.constant dense<0xFF800000> : vector<8xf32>
    %7 = vector.multi_reduction <maximumf>, %6, %cst_11 [1] : vector<8x8xf32> to vector<8xf32>
    %8 = vector.shape_cast %7 : vector<8xf32> to vector<8x1xf32>
    %9 = vector.broadcast %8 : vector<8x1xf32> to vector<8x8xf32>
    %10 = arith.subf %6, %9 : vector<8x8xf32>
    %11 = math.exp %10 : vector<8x8xf32>
    %cst_12 = arith.constant dense<0.000000e+00> : vector<8xf32>
    %12 = vector.multi_reduction <add>, %11, %cst_12 [1] : vector<8x8xf32> to vector<8xf32>
    %13 = vector.shape_cast %12 : vector<8xf32> to vector<8x1xf32>
    %cst_13 = arith.constant 1.000000e+00 : f32
    %14 = vector.broadcast %cst_13 : f32 to vector<8x1xf32>
    %15 = arith.divf %14, %13 : vector<8x1xf32>
    %16 = arith.truncf %11 : vector<8x8xf32> to vector<8x8xbf16>
    %cst_14 = arith.constant dense<0.000000e+00> : vector<8x8xf32>
    %17 = tpu.matmul %16, %5, %cst_14 {dimension_numbers = #tpu.dot_dimension_numbers<[1], [0], [0], [1], [0, 0, 1, 1], [], []>} : vector<8x8xbf16>, vector<8x8xbf16>, vector<8x8xf32> -> vector<8x8xf32>
    %18 = vector.broadcast %15 : vector<8x1xf32> to vector<8x8xf32>
    %19 = arith.mulf %17, %18 : vector<8x8xf32>
    %20 = vector.broadcast %15 : vector<8x1xf32> to vector<8x8xf32>
    %21 = arith.mulf %11, %20 : vector<8x8xf32>
    %c0_15 = arith.constant 0 : index
    %c0_16 = arith.constant 0 : index
    %c0_17 = arith.constant 0 : index
    %c0_18 = arith.constant 0 : index
    %22 = vector.load %arg7[%c0_15, %c0_16, %c0_17, %c0_18] : memref<1x1x8x8xf32, #tpu.memory_space<vmem>>, vector<1x1x8x8xf32>
    %23 = vector.shape_cast %22 : vector<1x1x8x8xf32> to vector<8x8xf32>
    %24 = vector.shape_cast %21 : vector<8x8xf32> to vector<1x1x8x8xf32>
    tpu.vector_store %arg7[%c0_15, %c0_16, %c0_17, %c0_18], %24 {strides = array<i32>} : memref<1x1x8x8xf32, #tpu.memory_space<vmem>>, vector<1x1x8x8xf32>,
    %25 = arith.truncf %19 : vector<8x8xf32> to vector<8x8xbf16>
    %c0_19 = arith.constant 0 : index
    %c0_20 = arith.constant 0 : index
    %c0_21 = arith.constant 0 : index
    %c0_22 = arith.constant 0 : index
    %26 = vector.load %arg6[%c0_19, %c0_20, %c0_21, %c0_22] : memref<1x1x8x8xbf16, #tpu.memory_space<vmem>>, vector<1x1x8x8xbf16>
    %27 = vector.shape_cast %26 : vector<1x1x8x8xbf16> to vector<8x8xbf16>
    %28 = vector.shape_cast %25 : vector<8x8xbf16> to vector<1x1x8x8xbf16>
    tpu.vector_store %arg6[%c0_19, %c0_20, %c0_21, %c0_22], %28 {strides = array<i32>} : memref<1x1x8x8xbf16, #tpu.memory_space<vmem>>, vector<1x1x8x8xbf16>,
    return
  }
  func.func @transform_0(%arg0: i32, %arg1: i32, %arg2: i32) -> (i32, i32, i32, i32) {
    %c0_i32 = arith.constant 0 : i32
    %c0_i32_0 = arith.constant 0 : i32
    return %arg0, %arg1, %arg2, %c0_i32 : i32, i32, i32, i32
  }
  func.func @transform_1(%arg0: i32, %arg1: i32, %arg2: i32) -> (i32, i32, i32, i32) {
    %c0_i32 = arith.constant 0 : i32
    %c0_i32_0 = arith.constant 0 : i32
    %c0_i32_1 = arith.constant 0 : i32
    return %arg0, %arg1, %c0_i32, %c0_i32_0 : i32, i32, i32, i32
  }
  func.func @transform_2(%arg0: i32, %arg1: i32, %arg2: i32) -> (i32, i32, i32, i32) {
    %c0_i32 = arith.constant 0 : i32
    %c0_i32_0 = arith.constant 0 : i32
    %c0_i32_1 = arith.constant 0 : i32
    return %arg0, %arg1, %c0_i32, %c0_i32_0 : i32, i32, i32, i32
  }
  func.func @transform_3(%arg0: i32, %arg1: i32, %arg2: i32) -> (i32, i32, i32, i32) {
    %c0_i32 = arith.constant 0 : i32
    %c0_i32_0 = arith.constant 0 : i32
    return %arg0, %arg1, %arg2, %c0_i32 : i32, i32, i32, i32
  }
  func.func @transform_4(%arg0: i32, %arg1: i32, %arg2: i32) -> (i32, i32, i32, i32) {
    %c0_i32 = arith.constant 0 : i32
    %c0_i32_0 = arith.constant 0 : i32
    return %arg0, %arg1, %arg2, %c0_i32 : i32, i32, i32, i32
  }
}

module attributes {stable_mosaic.version = 11 : i64} {
  func.func @_matmul_bias_kernel(%arg0: i32, %arg1: i32, %arg2: i32, %arg3: memref<16x32xbf16, #tpu.memory_space<vmem>>, %arg4: memref<32x32xbf16, #tpu.memory_space<vmem>>, %arg5: memref<1x32xf32, #tpu.memory_space<vmem>>, %arg6: memref<16x32xf32, #tpu.memory_space<vmem>>, %arg7: memref<16x32xf32, #tpu.memory_space<vmem>>) attributes {dimension_semantics = [#tpu.dimension_semantics<parallel>, #tpu.dimension_semantics<parallel>, #tpu.dimension_semantics<arbitrary>], iteration_bounds = array<i64: 1, 1, 1>, scalar_prefetch = 0 : i64, scratch_operands = 1 : i64, tpu.core_type = #tpu.core_type<tc>, window_params = [{transform_indices = @transform_0, window_bounds = array<i64: 16, 32>}, {transform_indices = @transform_1, window_bounds = array<i64: 32, 32>}, {transform_indices = @transform_2, window_bounds = array<i64: 1, 32>}, {transform_indices = @transform_3, window_bounds = array<i64: 16, 32>}]} {
    %c0_i32 = arith.constant 0 : i32
    %0 = arith.cmpi eq, %arg2, %c0_i32 : i32
    %1 = arith.extui %0 : i1 to i32
    %c0_i32_0 = arith.constant 0 : i32
    %2 = arith.cmpi ne, %1, %c0_i32_0 : i32
    scf.if %2 {
      %cst_10 = arith.constant 0.000000e+00 : f32
      %12 = vector.broadcast %cst_10 : f32 to vector<16x32xf32>
      %c0_11 = arith.constant 0 : index
      %c0_12 = arith.constant 0 : index
      %13 = vector.load %arg7[%c0_11, %c0_12] : memref<16x32xf32, #tpu.memory_space<vmem>>, vector<16x32xf32>
      tpu.vector_store %arg7[%c0_11, %c0_12], %12 {strides = array<i32>} : memref<16x32xf32, #tpu.memory_space<vmem>>, vector<16x32xf32>,
    } else {
    }
    %c0 = arith.constant 0 : index
    %c0_1 = arith.constant 0 : index
    %3 = vector.load %arg7[%c0, %c0_1] : memref<16x32xf32, #tpu.memory_space<vmem>>, vector<16x32xf32>
    %c0_2 = arith.constant 0 : index
    %c0_3 = arith.constant 0 : index
    %4 = vector.load %arg3[%c0_2, %c0_3] : memref<16x32xbf16, #tpu.memory_space<vmem>>, vector<16x32xbf16>
    %c0_4 = arith.constant 0 : index
    %c0_5 = arith.constant 0 : index
    %5 = vector.load %arg4[%c0_4, %c0_5] : memref<32x32xbf16, #tpu.memory_space<vmem>>, vector<32x32xbf16>
    %cst = arith.constant dense<0.000000e+00> : vector<16x32xf32>
    %6 = tpu.matmul %4, %5, %cst {dimension_numbers = #tpu.dot_dimension_numbers<[1], [0], [0], [1], [0, 0, 1, 1], [], []>} : vector<16x32xbf16>, vector<32x32xbf16>, vector<16x32xf32> -> vector<16x32xf32>
    %7 = arith.addf %3, %6 : vector<16x32xf32>
    %c0_6 = arith.constant 0 : index
    %c0_7 = arith.constant 0 : index
    %8 = vector.load %arg7[%c0_6, %c0_7] : memref<16x32xf32, #tpu.memory_space<vmem>>, vector<16x32xf32>
    tpu.vector_store %arg7[%c0_6, %c0_7], %7 {strides = array<i32>} : memref<16x32xf32, #tpu.memory_space<vmem>>, vector<16x32xf32>,
    %c0_i32_8 = arith.constant 0 : i32
    %9 = arith.cmpi eq, %arg2, %c0_i32_8 : i32
    %10 = arith.extui %9 : i1 to i32
    %c0_i32_9 = arith.constant 0 : i32
    %11 = arith.cmpi ne, %10, %c0_i32_9 : i32
    scf.if %11 {
      %c0_10 = arith.constant 0 : index
      %c0_11 = arith.constant 0 : index
      %12 = vector.load %arg7[%c0_10, %c0_11] : memref<16x32xf32, #tpu.memory_space<vmem>>, vector<16x32xf32>
      %c0_12 = arith.constant 0 : index
      %c0_13 = arith.constant 0 : index
      %13 = vector.load %arg5[%c0_12, %c0_13] : memref<1x32xf32, #tpu.memory_space<vmem>>, vector<1x32xf32>
      %14 = vector.broadcast %13 : vector<1x32xf32> to vector<16x32xf32>
      %15 = arith.addf %12, %14 : vector<16x32xf32>
      %c0_14 = arith.constant 0 : index
      %c0_15 = arith.constant 0 : index
      %16 = vector.load %arg6[%c0_14, %c0_15] : memref<16x32xf32, #tpu.memory_space<vmem>>, vector<16x32xf32>
      tpu.vector_store %arg6[%c0_14, %c0_15], %15 {strides = array<i32>} : memref<16x32xf32, #tpu.memory_space<vmem>>, vector<16x32xf32>,
    } else {
    }
    return
  }
  func.func @transform_0(%arg0: i32, %arg1: i32, %arg2: i32) -> (i32, i32) {
    %c0_i32 = arith.constant 0 : i32
    return %arg0, %arg2 : i32, i32
  }
  func.func @transform_1(%arg0: i32, %arg1: i32, %arg2: i32) -> (i32, i32) {
    %c0_i32 = arith.constant 0 : i32
    return %arg2, %arg1 : i32, i32
  }
  func.func @transform_2(%arg0: i32, %arg1: i32, %arg2: i32) -> (i32, i32) {
    %c0_i32 = arith.constant 0 : i32
    %c0_i32_0 = arith.constant 0 : i32
    return %c0_i32, %arg1 : i32, i32
  }
  func.func @transform_3(%arg0: i32, %arg1: i32, %arg2: i32) -> (i32, i32) {
    %c0_i32 = arith.constant 0 : i32
    return %arg0, %arg1 : i32, i32
  }
}

</mosaic_0001>

<bundles_post_ra>
// kernel: attention_forward.5
= control target key start
LH: loop header
LB: loop body
LE: loop exit
PB: predicated region body
PF: predicated region fallthrough
CT: control target
= control target key end

     0   :  { %vm19_vm0 = vcmask 261120   ;;  %v150_v0 = vmov 0.0   ;;  %vm151_vm1 = vmmov 0   ;;  %vm118_vm2 = vcmask 257024   ;;  %s195_s1 = inlined_call_operand.vmem [shape: bf16[32,32], index: 1, kind: input, shape index: {}]   ;;  %s196_s0 = inlined_call_operand.vmem [shape: bf16[16,32], index: 0, kind: input, shape index: {}]   ;;  %s197_s2 = inlined_call_operand.vmem [shape: f32[1,32], index: 2, kind: input, shape index: {}]   ;;  %s198_s3 = inlined_call_operand.vmem [shape: bf16[16,32], index: 3, kind: output, shape index: {}]  }
   0x1   :  { %137 = vmatprep.subr.bf16.mxu0 %v150_v0  ;;  %v147_v1 = vld [vmem:[%s195_s1] sm:$0xff]   ;;  %141 = vmatprep.mubr.msk.bf16.mxu0 %vm151_vm1, %v150_v0  ;;  %20 = vst.msk [vmem:[#allocation2] sm:$0xff] %vm19_vm0, %v150_v0  ;;  %21 = vst.msk [vmem:[#allocation2 + $0x8] sm:$0xff] %vm19_vm0, %v150_v0  ;;  %v148_v2 = vld [vmem:[%s195_s1 + $0x8] sm:$0xff]  }
   0x2   :  { %138 = vmatpush3.bf16.msra.mxu0 %v147_v1  ;;  %v149_v3 = vld [vmem:[%s196_s0] sm:$0xff]  }
   0x3   :  { %139 = vmatprep.subr.bf16.mxu0 %v150_v0  ;;  %v129_v12 = vld [vmem:[%s197_s2] ss:$0 sm:$0xff] }
   0x6   :  { %140 = vmatpush3.bf16.msra.mxu0 %v148_v2 }
   0x8   :  { %v22_v4 = vld [vmem:[#allocation2] sm:$0xff]  ;;  %v23_v6 = vld [vmem:[#allocation2 + $0x8] sm:$0xff] }
   0x9   :  { %142 = vmatmul.mubr.msk.bf16.vlgmr.msra.gmra.mrb[0].mxu0 %vm19_vm0, %v149_v3 }
  0xdc   :  { %v85_v5 = vpop.f32.mrb[0].mxu0 }
  0xdd   :  { %v92_v7 = vadd.f32 %v85_v5, %v22_v4  ;;  %v143_v8 = vpop.f32.mrb[1].mxu0 }
  0xde   :  { %v88_v9 = vpop.f32.mrb[2].mxu0 }
  0xdf   :  { %94 = vst.msk [vmem:[#allocation2] sm:$0xff] %vm19_vm0, %v92_v7  ;;  %v93_v10 = vadd.f32 %v88_v9, %v23_v6  ;;  %v144_v11 = vpop.f32.mrb[3].mxu0 }
  0xe1   :  { %95 = vst.msk [vmem:[#allocation2 + $0x8] sm:$0xff] %vm19_vm0, %v93_v10 }
  0xe6   :  { %v99_v13 = vld [vmem:[#allocation2] sm:$0xff] }
  0xe7   :  { %v108_v14 = vadd.f32 %v129_v12, %v99_v13 }
  0xe8   :  { %v100_v15 = vld [vmem:[#allocation2 + $0x8] sm:$0xff] }
  0xe9   :  { %v132_v16 = vpack.c.bf16 %v108_v14, %v108_v14  ;;  %v109_v17 = vadd.f32 %v129_v12, %v100_v15 }
  0xeb   :  { %119 = vst.msk [vmem:[%s198_s3] sm:$0xf] %vm118_vm2, %v132_v16  ;;  %v133_v18 = vpack.c.bf16 %v109_v17, %v109_v17 }
  0xed   :  { %120 = vst.msk [vmem:[%s198_s3 + $0x4] sm:$0xf] %vm118_vm2, %v133_v18 }

// kernel: attention_forward.8
= control target key start
LH: loop header
LB: loop body
LE: loop exit
PB: predicated region body
PF: predicated region fallthrough
CT: control target
= control target key end

     0   :  { %10 = vsyncpa [#allocation3], 0  ;;  %s1040_s0 = inlined_call_operand.vmem [shape: bf16[2,4,8,8], index: 0, kind: input, shape index: {}]   ;;  %s1041_s1 = inlined_call_operand.vmem [shape: bf16[2,4,8,8], index: 1, kind: input, shape index: {}]   ;;  %s1042_s2 = inlined_call_operand.vmem [shape: bf16[2,4,8,8], index: 2, kind: input, shape index: {}]   ;;  %s1043_s3 = inlined_call_operand.vmem [shape: bf16[2,4,8,8], index: 3, kind: output, shape index: {0}]   ;;  %s1044_s4 = inlined_call_operand.hbm [shape: f32[2,4,8,8], index: 4, kind: output, shape index: {1}]  }
   0x1   :  { %12 = vsyncpa [#allocation3 + $0x1], 0  ;;  %s881_s15 = smov 0   ;;  %s883_s16 = smov 0  }
   0x2   :  { %s885_s17 = smov 0   ;;  %s887_s18 = smov 0  }
   0x3   :  { %s889_s19 = smov 0   ;;  %s891_s20 = smov 0  }
   0x4   :  { %s893_s21 = smov 0   ;;  %s895_s22 = smov 0  }
   0x5 LB: > { %s643_s23 = sadd.s32 4294967295, %s851_s22   ;;  %s644_s24 = sadd.s32 4294967294, %s851_s22   ;;  %s851_s22 = sphi %s895_s22, %s18_s22   ;;  %s847_s21 = sphi %s893_s21, %s1053_s21   ;;  %s843_s20 = sphi %s891_s20, %s1052_s20   ;;  %s839_s19 = sphi %s889_s19, %s1051_s19   ;;  %s835_s18 = sphi %s887_s18, %s1050_s18   ;;  %s831_s17 = sphi %s885_s17, %s1049_s17   ;;  %s827_s16 = sphi %s883_s16, %s1048_s16   ;;  %s823_s15 = sphi %s881_s15, %s1047_s15  }
   0x6   : > { %s33_s25 = sadd.s32 1, %s843_s20  ;;  %s37_s26 = sadd.s32 1, %s847_s21 }
   0x7   : > { %p35_p0 = scmp.ge.s32.totalorder %s33_s25, 4  ;;  %p174_p1 = scmp.ne.s32.totalorder %s831_s17, %s827_s16 }
   0x8   : > { %p175_p2 = scmp.eq.s32.totalorder %s643_s23, 7  ;;  %p180_p5 = scmp.ne.s32.totalorder %s827_s16, %s823_s15 }
   0x9   : > { %s1055_s25 = smov (%p35_p0, %s33_s25), 0  ;;  %s1057_s26 = smov (!%p35_p0, %s37_s26), %s847_s21 }
   0xa   : > { %s158_s27 = ssub.s32 %s843_s20, %s1055_s25  ;;  %p932_p3 = por %p175_p2, %p174_p1 }
   0xb   : > { %p39_p4 = scmp.ge.s32.totalorder %s1057_s26, 2  ;;  %p181_p6 = scmp.eq.s32.totalorder %s644_s24, 7 }
   0xc   : > { %p647_p7 = scmp.ge.s32.totalorder %s851_s22, 1  ;;  %p235_p9 = scmp.lt.s32.totalorder %s851_s22, 9 }
   0xd   : > { %s1059_s26 = smov (%p39_p4, %s1057_s26), 0  ;;  %p941_p8 = por %p181_p6, %p180_p5 }
   0xe   : > { %s157_s30 = ssub.s32 %s847_s21, %s1059_s26  ;;  %s164_s5 = sadd.s32 1, %s831_s17 }
   0xf   : > { %s159_s6 = sor.u32 %s158_s27, %s157_s30  ;;  %p236_p10 = pnand %p647_p7, %p235_p9 }
  0x10   : > { %p162_p11 = scmp.eq.s32.totalorder %s159_s6, 0  ;;  %p294_p12 = scmp.lt.s32.totalorder (!%p236_p10), %s839_s19, 1  ;;  %v853_v0 = vmov (!%p236_p10), 0.0   ;;  %vm854_vm0 = vmmov (!%p236_p10), 0   ;;  %vm340_vm1 = vcmask (!%p236_p10), 1043456   ;;  %vm336_vm2 = vcmask (!%p236_p10), 64512  }
  0x11   : > { %239 = sbr.rel (%p236_p10) target bundleno = 624 (0x270), region = 32  ;;  %p296_p13 = scmp.lt.s32.totalorder (!%p236_p10), %s835_s18, 3  ;;  %668 = vmatprep.subr.bf16.mxu0 (!%p236_p10), %v853_v0  ;;  %670 = vmatprep.mubr.msk.bf16.mxu0 (!%p236_p10), %vm854_vm0, %v853_v0 }
  0x12   : > { %s950_s7 = scalar_select %p162_p11, %s831_s17, %s164_s5  }
  0x13   : > { %674 = vmatprep.subr.bf16.mxu1 (!%p236_p10), %v853_v0  ;;  %676 = vmatprep.mubr.msk.bf16.mxu1 (!%p236_p10), %vm854_vm0, %v853_v0 }
  0x18   : > { %s295_s8 = scalar_select %p294_p12, %s839_s19, 1 }
  0x19   : > { %s297_s9 = scalar_select %p296_p13, %s835_s18, 3 }
  0x1a   : > { %s649_s10 = sshll.u32 %s295_s8, 2 }
  0x1b   : > { %s302_s11 = sadd.s32 %s649_s10, %s297_s9  ;;  %s291_s9 = sand.u32 1, %s827_s16  }
  0x1c   : > { %s956_s12 = sshll.u32 %s302_s11, 2  ;;  %s660_s10 = sshll.u32 %s839_s19, 2 }
  0x1d   : > { %s312_s23 = scalar_lea.vmem %s1041_s1, %s956_s12  ;;  %s304_s30 = scalar_lea.vmem %s1040_s0, %s956_s12 }
  0x1e   : > { %v334_v1 = vld [vmem:[%s312_s23] sm:$0xf]  ;;  %s320_s8 = scalar_lea.vmem %s1042_s2, %s956_s12  ;;  %s648_s11 = sshll.u32 %s291_s9, 3 }
  0x1f   : > { %v342_v2 = vsel %vm340_vm1, %v334_v1, 0  ;;  %v333_v3 = vld [vmem:[%s304_s30] sm:$0xf]  ;;  %s475_s13 = sadd.s32 %s835_s18, %s660_s10  ;;  %s293_s23 = scalar_lea.vmem [#allocation2], %s648_s11 }
  0x20   : > { %669 = vmatpush3.bf16.msra.mxu0 %v342_v2  ;;  %v335_v9 = vld [vmem:[%s320_s8] sm:$0xf]  ;;  %s661_s14 = sshll.u32 %s475_s13, 7  ;;  %s479_s24 = sshll.u32 %s293_s23, 4  ;;  %s984_s24 = int_to_ptr.vmem [resolvable:$true] %s479_s24 }
  0x21   : > { %v400_v10 = vsel %vm340_vm1, %v335_v9, 0  ;;  %s982_s5 = scalar_lea.hbm %s1044_s4, %s661_s14  ;;  %s460_s19 = scalar_lea.sflag [#allocation3], %s291_s9 }
  0x22   : > { %675 = vmatpush3.bf16.msra.mxu1 %v400_v10  ;;  %s757_s6 = scalar_lea.vmem %s984_s24, 128  ;;  %s855_s18 = smov [#allocation2]  }
  0x23   : > { %671 = vmatmul.mubr.msk.bf16.vlgmr.msra.gmra.mrb[0].mxu0 %vm336_vm2, %v333_v3  ;;  %p758_p0 = scmp.ne.s32.totalorder %s984_s24, %s757_s6  ;;  %s761_s8 = sshll.u32 %s855_s18, 4  ;;  %s762_s8 = int_to_ptr.vmem [resolvable:$false] %s761_s8 }
  0x24   : > { %s763_s10 = scalar_lea.vmem %s762_s8, 256  ;;  %p764_p4 = scmp.lt.s32.totalorder %s984_s24, %s762_s8 }
  0x25   : > { %p759_p1 = pnand %p758_p0, %p932_p3  ;;  %p765_p5 = scmp.lt.s32.totalorder %s763_s10, %s757_s6 }
  0x27   : > { %p760_p2 = pneg %p759_p1  ;;  %p766_p6 = por %p765_p5, %p764_p4 }
  0x29   : > { %p767_p7 = pnand %p766_p6, %p760_p2 }
  0xf6   : > { %v378_v4 = vpop.f32.mrb[0].mxu0 }
  0xf7   : > { %v672_v5 = vpop.f32.mrb[1].mxu0  ;;  %v384_v6 = vsel %vm336_vm2, %v378_v4, -inf }
  0xf8   : > { %385 = vmax.xlane.f32.xlu0 %v384_v6  ;;  %v381_v7 = vpop.f32.mrb[2].mxu0 }
  0xf9   : > { %v673_v8 = vpop.f32.mrb[3].mxu0 }
 0x185   : > { %v386_v11 = vpop.xlane.xlu0 %385 }
 0x186   : > { %v387_v12 = vsub.f32 %v378_v4, %v386_v11 }
 0x188   : > { %v388_v13 = vmul.f32 1.442695, %v387_v12 }
 0x18a   : > { %753 = vpow2.f32 %v388_v13 }
 0x194   : > { %v754_v14 = vpop.eup %753 }
 0x195   : > { %v390_v15 = vsel %vm336_vm2, %v754_v14, 0.0  ;;  %v395_v16 = vpack.c.bf16 %v754_v14, %v754_v14 }
 0x196   : > { %391 = vadd.xlane.f32.xlu0 %v390_v15 }
 0x197   : > { %677 = vmatmul.mubr.msk.bf16.vlgmr.msra.gmra.mrb[0].mxu1 %vm336_vm2, %v395_v16 }
 0x223   : > { %v392_v17 = vpop.xlane.xlu0 %391 }
 0x224   : > { %755 = vrcp.f32 %v392_v17 }
 0x22e   : > { %v756_v18 = vpop.eup %755 }
 0x22f   : > { %v443_v19 = vmul.f32 %v756_v18, %v754_v14 }
 0x231   : > { %444 = vst.msk [vmem:[%s293_s23] sm:$0xff] %vm336_vm2, %v443_v19 }
 0x232   : > { %770 = shalt.err (!%p767_p7)
}
 0x233   : > { %s771_s9 = scalar_lea.hbm %s982_s5, 128  ;;  %s775_s14 = scalar_lea.hbm %s1044_s4, 1024 }
 0x234   : > { %p772_p9 = scmp.ne.s32.totalorder %s982_s5, %s771_s9  ;;  %p776_p12 = scmp.lt.u32.totalorder %s982_s5, %s1044_s4 }
 0x235   : > { %p777_p13 = scmp.lt.u32.totalorder %s775_s14, %s771_s9  ;;  %p779_p1 = scmp.lt.u32.totalorder %s771_s9, %s982_s5 }
 0x236   : > { %p773_p10 = pnand %p772_p9, %p932_p3 }
 0x237   : > { %p778_p0 = por %p777_p13, %p776_p12 }
 0x238   : > { %p774_p11 = pneg %p773_p10 }
 0x239   : > { %p780_p2 = por %p779_p1, %p778_p0 }
 0x23b   : > { %p781_p4 = pnand %p780_p2, %p774_p11 }
 0x23d   : > { %784 = shalt.err (!%p781_p4)
}
 0x23e   : > { %680 = dma.vmem_to_hbm [thread:$0]  (%p932_p3), %s984_s24, 128, %s982_s5, %s460_s19   ;;  %vm446_vm3 = vcmask 60416  }
 0x23f   : > { %s331_s18 = scalar_lea.vmem %s1043_s3, %s956_s12 }
 0x26a   : > { %v436_v20 = vpop.f32.mrb[0].mxu1 }
 0x26b   : > { %v442_v21 = vmul.f32 %v756_v18, %v436_v20  ;;  %v678_v22 = vpop.f32.mrb[1].mxu1 }
 0x26c   : > { %v439_v23 = vpop.f32.mrb[2].mxu1 }
 0x26d   : > { %v445_v24 = vpack.c.bf16 %v442_v21, %v442_v21  ;;  %v679_v25 = vpop.f32.mrb[3].mxu1 }
 0x26f   : > { %447 = vst.msk [vmem:[%s331_s18] sm:$0xf] %vm446_vm3, %v445_v24 }
 0x270 PF: > { %p686_p5 = scmp.ge.s32.totalorder %s851_s22, 2  ;;  %s505_s28 = sand.u32 1, %s823_s15  }
 0x271   : > { %s506_s24 = scalar_lea.sflag [#allocation3], %s505_s28 }
 0x272   : > { %p683_p3 = pnand %p686_p5, %p941_p8 }
 0x274   : > { %818 = dma.done.wait (!%p683_p3), %s506_s24, 128  }
 0x275   : > { %820 = vsyncadd (!%p683_p3), %s506_s24, 4294967168  ;;  %s18_s22 = sadd.s32 1, %s851_s22   ;;  %s1047_s15 = smov %s827_s16 }
 0x276   : > { %p15_p6 = scmp.ge.s32.totalorder %s18_s22, 10   ;;  %s1048_s16 = smov %s831_s17 }
 0x277   : > { %s1049_s17 = smov %s950_s7  ;;  %s1050_s18 = smov %s843_s20 }
 0x278   : > { %s1051_s19 = smov %s847_s21  ;;  %s1052_s20 = smov %s1055_s25 }
 0x279   : > { %s1053_s21 = smov %s1059_s26  ;;  %17 = sbr.rel (!%p15_p6) target bundleno = 5 (0x5), region = 85 }
 0x280   :  { %511 = vsyncpa [#allocation3], 1 }
 0x281   :  { %513 = vsyncpa [#allocation3 + $0x1], 1 }

// kernel: attention_forward.9
= control target key start
LH: loop header
LB: loop body
LE: loop exit
PB: predicated region body
PF: predicated region fallthrough
CT: control target
= control target key end

     0   :  { %v177_v1 = vmov 0.0   ;;  %vm178_vm0 = vmmov 0   ;;  %vm20_vm1 = vcmask 261120   ;;  %s233_s0 = inlined_call_operand.vmem [shape: bf16[16,32], index: 0, kind: input, shape index: {}]   ;;  %s234_s1 = inlined_call_operand.vmem [shape: bf16[32,32], index: 1, kind: input, shape index: {}]   ;;  %s235_s2 = inlined_call_operand.vmem [shape: f32[1,32], index: 2, kind: input, shape index: {}]   ;;  %s236_s3 = inlined_call_operand.hbm [shape: f32[16,32], index: 3, kind: output, shape index: {}]  }
   0x1   :  { %v150_v0 = vld [vmem:[%s234_s1] sm:$0xff]   ;;  %137 = vmatprep.subr.bf16.mxu0 %v177_v1  ;;  %v151_v2 = vld [vmem:[%s234_s1 + $0x8] sm:$0xff]   ;;  %141 = vmatprep.mubr.msk.bf16.mxu0 %vm178_vm0, %v177_v1  ;;  %21 = vst.msk [vmem:[#allocation2] sm:$0xff] %vm20_vm1, %v177_v1  ;;  %22 = vst.msk [vmem:[#allocation2 + $0x8] sm:$0xff] %vm20_vm1, %v177_v1 }
   0x2   :  { %138 = vmatpush3.bf16.msra.mxu0 %v150_v0 }
   0x3   :  { %139 = vmatprep.subr.bf16.mxu0 %v177_v1 }
   0x4   :  { %8 = vsyncpa [#allocation4], 0  ;;  %v152_v3 = vld [vmem:[%s233_s0] sm:$0xff]   ;;  %s179_s0 = smov [#allocation3]  }
   0x5   :  { %v133_v12 = vld [vmem:[%s235_s2] ss:$0 sm:$0xff]  ;;  %s118_s19 = sshll.u32 %s179_s0, 4  ;;  %s119_s19 = int_to_ptr.vmem [resolvable:$true] %s118_s19 }
   0x6   :  { %140 = vmatpush3.bf16.msra.mxu0 %v151_v2  ;;  %s153_s20 = scalar_lea.vmem %s119_s19, 256  ;;  %p158_p1 = scmp.lt.s32.totalorder %s119_s19, %s119_s19 }
   0x7   :  { %p154_p0 = scmp.ne.s32.totalorder %s119_s19, %s153_s20  ;;  %p159_p2 = scmp.lt.s32.totalorder %s153_s20, %s153_s20 }
   0x8   :  { %v23_v4 = vld [vmem:[#allocation2] sm:$0xff]  ;;  %v24_v6 = vld [vmem:[#allocation2 + $0x8] sm:$0xff] }
   0x9   :  { %142 = vmatmul.mubr.msk.bf16.vlgmr.msra.gmra.mrb[0].mxu0 %vm20_vm1, %v152_v3  ;;  %p160_p3 = por %p159_p2, %p158_p1 }
   0xb   :  { %p161_p4 = pnand %p160_p3, %p154_p0 }
  0xdc   :  { %v86_v5 = vpop.f32.mrb[0].mxu0 }
  0xdd   :  { %v93_v7 = vadd.f32 %v86_v5, %v23_v4  ;;  %v143_v8 = vpop.f32.mrb[1].mxu0 }
  0xde   :  { %v89_v9 = vpop.f32.mrb[2].mxu0 }
  0xdf   :  { %95 = vst.msk [vmem:[#allocation2] sm:$0xff] %vm20_vm1, %v93_v7  ;;  %v94_v10 = vadd.f32 %v89_v9, %v24_v6  ;;  %v144_v11 = vpop.f32.mrb[3].mxu0 }
  0xe1   :  { %96 = vst.msk [vmem:[#allocation2 + $0x8] sm:$0xff] %vm20_vm1, %v94_v10 }
  0xe6   :  { %v100_v13 = vld [vmem:[#allocation2] sm:$0xff] }
  0xe7   :  { %v109_v14 = vadd.f32 %v133_v12, %v100_v13 }
  0xe8   :  { %v101_v15 = vld [vmem:[#allocation2 + $0x8] sm:$0xff] }
  0xe9   :  { %v110_v16 = vadd.f32 %v133_v12, %v101_v15  ;;  %111 = vst.msk [vmem:[#allocation3] sm:$0xff] %vm20_vm1, %v109_v14 }
  0xeb   :  { %112 = vst.msk [vmem:[#allocation3 + $0x8] sm:$0xff] %vm20_vm1, %v110_v16 }
  0xec   :  { %164 = shalt.err (!%p161_p4)
}
  0xed   :  { %s165_s22 = scalar_lea.hbm %s236_s3, 256 }
  0xee   :  { %p166_p5 = scmp.ne.s32.totalorder %s236_s3, %s165_s22  ;;  %p169_p6 = scmp.lt.u32.totalorder %s165_s22, %s236_s3 }
  0xf0   :  { %p171_p7 = pnand %p169_p6, %p166_p5 }
  0xf2   :  { %174 = shalt.err (!%p171_p7)
}
  0xf3   :  { %s180_s27 = smov 128   ;;  %s181_s28 = smov 8  }
  0xf4   :  { %124 = dma.vmem_to_hbm [thread:$0]  %s119_s19, 256, %s236_s3, [#allocation4], %s180_s27, %s180_s27, %s181_s28  }
  0xf5   :  { %175 = dma.done.wait [#allocation4], 256  }
  0xf6   :  { %176 = vsyncadd [#allocation4], 4294967040 }
  0xf7   :  { %128 = vsyncpa [#allocation4], 1 }

</bundles_post_ra>
